<compile_context>
chip_gen: v7x
topology: tpu7x:2x2x1
jax: 0.10.0
libtpu: 0.0.40
codegen_flags: <defaults>
</compile_context>

<pallas_src>
import math
import numpy as np
import jax
import jax.numpy as jnp
from jax import lax
from jax.experimental import pallas as pl
from jax.experimental.pallas import tpu as pltpu

# FRFN hyper-parameters (PyTorch module defaults).
DIM = 32
HIDDEN = 128
DIM_CONV = DIM // 4              # 8
DIM_UNTOUCHED = DIM - DIM_CONV   # 24

_SQRT_2_OVER_PI = 0.7978845608028654


def _gelu(v):
    # tanh-approx GELU: 0.5*v*(1+tanh(sqrt(2/pi)*(v+0.044715*v^3))).
    # ~7 VALU ops + one EUP tanh per element; |err| <= ~3e-4 vs exact erf GELU.
    u = _SQRT_2_OVER_PI * (v + 0.044715 * (v * v * v))
    return 0.5 * v * (1.0 + jnp.tanh(u))


def frfn_kernel(x_ref, mfirst_ref, mlast_ref, w1cat_ref, b1_ref,
                wdw_ref, bdw_ref, w2t_ref, b2_ref, o_ref):
    x = x_ref[...]                      # (rows, DIM) f32, rows = b_tile * hw
    mfirst = mfirst_ref[...]            # (rows, 1) f32: 0.0 at t == 0 of each sequence
    mlast = mlast_ref[...]              # (rows, 1) f32: 0.0 at t == hw-1 of each sequence
    rows = x.shape[0]
    mm_dt = w1cat_ref.dtype             # MXU input dtype (f32 or bf16)

    # Masked XLU rotations (both shifts non-negative).  The wrapped-around rows are
    # exactly the rows the masks zero, so block wraparound is harmless.
    def shift_prev(a):                  # out[t] = a[t-1] inside each sequence, else 0
        return mfirst * pltpu.roll(a, shift=1, axis=0)

    def shift_next(a):                  # out[t] = a[t+1] inside each sequence, else 0
        return mlast * pltpu.roll(a, shift=rows - 1, axis=0)

    # ---- partial_conv3 folded into linear1: ONE K=3*DIM MXU matmul + GELU ----
    xcat = jnp.concatenate([shift_prev(x), x, shift_next(x)], axis=-1)   # (rows, 96)
    h = jnp.dot(xcat.astype(mm_dt), w1cat_ref[...],
                preferred_element_type=jnp.float32) + b1_ref[...]
    h = _gelu(h)                        # (rows, 2*HIDDEN) f32
    x_1 = h[:, :HIDDEN]                 # 128-lane-aligned splits
    x_2 = h[:, HIDDEN:]

    # ---- depthwise conv1d (groups=hidden, k=3, pad=1) + GELU (f32 on VPU/XLU) ----
    dw = (shift_prev(x_1) * wdw_ref[0:1, :]
          + x_1 * wdw_ref[1:2, :]
          + shift_next(x_1) * wdw_ref[2:3, :]
          + bdw_ref[...])
    x_1 = _gelu(dw)

    # ---- gating, linear2, residual ----
    y = jnp.dot((x_1 * x_2).astype(mm_dt), w2t_ref[...],
                preferred_element_type=jnp.float32) + b2_ref[...]
    o_ref[...] = (y + x).astype(o_ref.dtype)


def frfn_forward(x, params, *, matmul_dtype=jnp.float32, rows_per_block=4096):
    """FRFN forward.  x: (bs, hw, DIM) f32.  matmul_dtype=jnp.bfloat16 is an optional
    MXU fast path for v6e/v7x (accumulation + elementwise math stay f32)."""
    bs, hw, c = x.shape
    assert c == DIM
    wpc, w1, b1, wdw, bdw, w2, b2 = (params[k] for k in
                                     ("wpc", "w1", "b1", "wdw", "bdw", "w2", "b2"))
    hp = lax.Precision.HIGHEST

    # --- fold partial_conv3 into linear1: one (3*DIM, 2*HIDDEN) weight slab ---
    # Conv tap k=0 multiplies x[t-1], k=1 x[t], k=2 x[t+1] (cross-correlation, pad=1).
    wpc_t = jnp.transpose(wpc, (2, 1, 0)).astype(jnp.float32)     # (k=3, in, out)
    w1t = jnp.transpose(w1).astype(jnp.float32)                   # (DIM, 2*HIDDEN)
    top = jnp.einsum("kio,oh->kih", wpc_t, w1t[:DIM_CONV], precision=hp)   # (3, 8, 2H)
    zeros = jnp.zeros((DIM_UNTOUCHED, 2 * HIDDEN), jnp.float32)
    w1cat = jnp.concatenate([
        jnp.concatenate([top[0], zeros], axis=0),                 # applied to x[t-1]
        jnp.concatenate([top[1], w1t[DIM_CONV:]], axis=0),        # applied to x[t]
        jnp.concatenate([top[2], zeros], axis=0),                 # applied to x[t+1]
    ], axis=0).astype(matmul_dtype)                               # (3*DIM, 2*HIDDEN)

    b1r = b1.reshape(1, 2 * HIDDEN).astype(jnp.float32)
    wdw2 = jnp.transpose(wdw[:, 0, :]).astype(jnp.float32)        # (3, HIDDEN)
    bdwr = bdw.reshape(1, HIDDEN).astype(jnp.float32)
    w2t = jnp.transpose(w2).astype(matmul_dtype)                  # (HIDDEN, DIM)
    b2r = b2.reshape(1, DIM).astype(jnp.float32)

    # --- batch tiling: whole sequences per block, bounded rows, >=2 grid steps ---
    def _round_up(a, m):
        return -(-a // m) * m

    u = 8 // math.gcd(hw, 8)                 # smallest batch tile giving 8-aligned sublanes
    budget = max(1, rows_per_block // hw)    # batch tile fitting the per-block row budget
    b_tile = max(u, (budget // u) * u)
    if bs > u:                               # let v7x's two TensorCores both get work
        b_tile = min(b_tile, _round_up(-(-bs // 2), u))
    b_tile = min(b_tile, _round_up(bs, u))   # never larger than the aligned batch
    bs_pad = _round_up(bs, b_tile)           # pad batch instead of whole-batch fallback
    grid_n = bs_pad // b_tile
    rows = b_tile * hw

    if bs_pad != bs:
        x = jnp.pad(x, ((0, bs_pad - bs), (0, 0), (0, 0)))
    x2d = x.reshape(bs_pad * hw, DIM)

    # k=3 sequence-boundary masks, built once per shape and streamed (negligible BW).
    pos = jnp.arange(bs_pad * hw, dtype=jnp.int32) % hw
    mfirst = (pos != 0).astype(jnp.float32)[:, None]
    mlast = (pos != hw - 1).astype(jnp.float32)[:, None]

    # ~few KiB of f32 intermediates per row; keep headroom, cap at v7x-safe 64 MiB.
    vmem_limit = int(min(64 * 1024 * 1024, max(32 * 1024 * 1024, rows * 10 * 1024)))

    out2d = pl.pallas_call(
        frfn_kernel,
        out_shape=jax.ShapeDtypeStruct((bs_pad * hw, DIM), x.dtype),
        grid=(grid_n,),
        in_specs=[
            pl.BlockSpec((rows, DIM), lambda i: (i, 0)),               # x rows
            pl.BlockSpec((rows, 1), lambda i: (i, 0)),                 # mask: first-of-seq
            pl.BlockSpec((rows, 1), lambda i: (i, 0)),                 # mask: last-of-seq
            pl.BlockSpec((3 * DIM, 2 * HIDDEN), lambda i: (0, 0)),     # fused conv+W1 slab
            pl.BlockSpec((1, 2 * HIDDEN), lambda i: (0, 0)),           # b1
            pl.BlockSpec((3, HIDDEN), lambda i: (0, 0)),               # dwconv taps
            pl.BlockSpec((1, HIDDEN), lambda i: (0, 0)),               # dwconv bias
            pl.BlockSpec((HIDDEN, DIM), lambda i: (0, 0)),             # W2^T
            pl.BlockSpec((1, DIM), lambda i: (0, 0)),                  # b2
        ],
        out_specs=pl.BlockSpec((rows, DIM), lambda i: (i, 0)),
        compiler_params=pltpu.CompilerParams(
            dimension_semantics=("parallel",),
            vmem_limit_bytes=vmem_limit),
    )(x2d, mfirst, mlast, w1cat, b1r, wdw2, bdwr, w2t, b2r)
    return out2d[: bs * hw].reshape(bs, hw, DIM)


def frfn_reference(x, params):
    # Pure-JAX reference mirroring the PyTorch forward (NCL convs, exact GELU).
    wpc, w1, b1, wdw, bdw, w2, b2 = (params[k] for k in
                                     ("wpc", "w1", "b1", "wdw", "bdw", "w2", "b2"))
    gelu = lambda v: jax.nn.gelu(v, approximate=False)
    hp = lax.Precision.HIGHEST
    xp = jnp.transpose(x, (0, 2, 1))                       # (bs, dim, hw)
    x1, x2 = xp[:, :DIM_CONV, :], xp[:, DIM_CONV:, :]
    x1 = lax.conv_general_dilated(x1, wpc, window_strides=(1,), padding=((1, 1),),
                                  dimension_numbers=("NCH", "OIH", "NCH"),
                                  precision=hp)
    xc = jnp.transpose(jnp.concatenate([x1, x2], axis=1), (0, 2, 1))
    h = gelu(jnp.dot(xc, w1.T, precision=hp) + b1)
    x_1, x_2 = h[..., :HIDDEN], h[..., HIDDEN:]
    dwv = lax.conv_general_dilated(jnp.transpose(x_1, (0, 2, 1)), wdw,
                                   window_strides=(1,), padding=((1, 1),),
                                   dimension_numbers=("NCH", "OIH", "NCH"),
                                   feature_group_count=HIDDEN,
                                   precision=hp) + bdw[None, :, None]
    x_1 = jnp.transpose(gelu(dwv), (0, 2, 1))
    y = jnp.dot(x_1 * x_2, w2.T, precision=hp) + b2
    return y + x


if __name__ == "__main__":
    key = jax.random.PRNGKey(0)
    ks = jax.random.split(key, 8)
    params = {
        "wpc": jax.random.normal(ks[1], (DIM_CONV, DIM_CONV, 3), jnp.float32)
               * (1.0 / math.sqrt(DIM_CONV * 3)),
        "w1": jax.random.normal(ks[2], (2 * HIDDEN, DIM), jnp.float32)
              * (1.0 / math.sqrt(DIM)),
        "b1": jax.random.normal(ks[3], (2 * HIDDEN,), jnp.float32) * 0.02,
        "wdw": jax.random.normal(ks[4], (HIDDEN, 1, 3), jnp.float32)
               * (1.0 / math.sqrt(3)),
        "bdw": jax.random.normal(ks[5], (HIDDEN,), jnp.float32) * 0.02,
        "w2": jax.random.normal(ks[6], (DIM, HIDDEN), jnp.float32)
              * (1.0 / math.sqrt(HIDDEN)),
        "b2": jax.random.normal(ks[7], (DIM,), jnp.float32) * 0.02,
    }

    # Primary small shape (bs=2, hw=16, dim=32): f32 MXU path; the tanh-vs-erf GELU
    # difference (<=~3e-4/element) stays well inside the 2e-3 tolerance.
    x = jax.random.normal(ks[0], (2, 16, DIM), dtype=jnp.float32)
    ref = jax.block_until_ready(frfn_reference(x, params))
    out = jax.block_until_ready(frfn_forward(x, params))
    np.testing.assert_allclose(np.asarray(out), np.asarray(ref), atol=2e-3, rtol=2e-3)

    # Odd sequence length + non-aligned batch: exercises batch zero-padding and the
    # sequence-boundary masks around the rolled shifts.
    x_odd = jax.random.normal(jax.random.fold_in(key, 1), (3, 9, DIM), dtype=jnp.float32)
    ref_odd = jax.block_until_ready(frfn_reference(x_odd, params))
    out_odd = jax.block_until_ready(frfn_forward(x_odd, params))
    np.testing.assert_allclose(np.asarray(out_odd), np.asarray(ref_odd),
                               atol=2e-3, rtol=2e-3)

    # Optional bf16 MXU fast path (v6e/v7x): weights/activations fed to the MXU in
    # bf16, f32 accumulation.  Loose sanity tolerance (bf16 rounds at ~4e-3).
    out_bf16 = jax.block_until_ready(
        frfn_forward(x, params, matmul_dtype=jnp.bfloat16))
    np.testing.assert_allclose(np.asarray(out_bf16), np.asarray(ref),
                               atol=2.5e-1, rtol=5e-2)

    print("KERNEL_OK")
</pallas_src>

<mosaic_0001>
module attributes {stable_mosaic.version = 11 : i64} {
  func.func @frfn_kernel(%arg0: i32, %arg1: memref<16x32xf32, #tpu.memory_space<vmem>>, %arg2: memref<16x1xf32, #tpu.memory_space<vmem>>, %arg3: memref<16x1xf32, #tpu.memory_space<vmem>>, %arg4: memref<96x256xf32, #tpu.memory_space<vmem>>, %arg5: memref<1x256xf32, #tpu.memory_space<vmem>>, %arg6: memref<3x128xf32, #tpu.memory_space<vmem>>, %arg7: memref<1x128xf32, #tpu.memory_space<vmem>>, %arg8: memref<128x32xf32, #tpu.memory_space<vmem>>, %arg9: memref<1x32xf32, #tpu.memory_space<vmem>>, %arg10: memref<16x32xf32, #tpu.memory_space<vmem>>) attributes {dimension_semantics = [#tpu.dimension_semantics<parallel>], iteration_bounds = array<i64: 2>, scalar_prefetch = 0 : i64, scratch_operands = 0 : i64, tpu.core_type = #tpu.core_type<tc>, window_params = [{transform_indices = @transform_0, window_bounds = array<i64: 16, 32>}, {transform_indices = @transform_1, window_bounds = array<i64: 16, 1>}, {transform_indices = @transform_2, window_bounds = array<i64: 16, 1>}, {pipeline_mode = #tpu.pipeline_mode<synchronous>, transform_indices = @transform_3, window_bounds = array<i64: 96, 256>}, {pipeline_mode = #tpu.pipeline_mode<synchronous>, transform_indices = @transform_4, window_bounds = array<i64: 1, 256>}, {pipeline_mode = #tpu.pipeline_mode<synchronous>, transform_indices = @transform_5, window_bounds = array<i64: 3, 128>}, {pipeline_mode = #tpu.pipeline_mode<synchronous>, transform_indices = @transform_6, window_bounds = array<i64: 1, 128>}, {pipeline_mode = #tpu.pipeline_mode<synchronous>, transform_indices = @transform_7, window_bounds = array<i64: 128, 32>}, {pipeline_mode = #tpu.pipeline_mode<synchronous>, transform_indices = @transform_8, window_bounds = array<i64: 1, 32>}, {transform_indices = @transform_9, window_bounds = array<i64: 16, 32>}]} {
    %c0 = arith.constant 0 : index
    %c0_0 = arith.constant 0 : index
    %0 = vector.load %arg1[%c0, %c0_0] : memref<16x32xf32, #tpu.memory_space<vmem>>, vector<16x32xf32>
    %c0_1 = arith.constant 0 : index
    %c0_2 = arith.constant 0 : index
    %1 = vector.load %arg2[%c0_1, %c0_2] : memref<16x1xf32, #tpu.memory_space<vmem>>, vector<16x1xf32>
    %c0_3 = arith.constant 0 : index
    %c0_4 = arith.constant 0 : index
    %2 = vector.load %arg3[%c0_3, %c0_4] : memref<16x1xf32, #tpu.memory_space<vmem>>, vector<16x1xf32>
    %c1_i32 = arith.constant 1 : i32
    %3 = tpu.dynamic_rotate %0 by %c1_i32 dim 0 : vector<16x32xf32>, i32 -> vector<16x32xf32>
    %4 = vector.broadcast %1 : vector<16x1xf32> to vector<16x32xf32>
    %5 = arith.mulf %4, %3 : vector<16x32xf32>
    %c15_i32 = arith.constant 15 : i32
    %6 = tpu.dynamic_rotate %0 by %c15_i32 dim 0 : vector<16x32xf32>, i32 -> vector<16x32xf32>
    %7 = vector.broadcast %2 : vector<16x1xf32> to vector<16x32xf32>
    %8 = arith.mulf %7, %6 : vector<16x32xf32>
    %9 = tpu.concatenate %5, %0, %8 in 1 : vector<16x32xf32>, vector<16x32xf32>, vector<16x32xf32> -> vector<16x96xf32>
    %c0_5 = arith.constant 0 : index
    %c0_6 = arith.constant 0 : index
    %10 = vector.load %arg4[%c0_5, %c0_6] : memref<96x256xf32, #tpu.memory_space<vmem>>, vector<96x256xf32>
    %cst = arith.constant dense<0.000000e+00> : vector<16x256xf32>
    %11 = tpu.matmul %9, %10, %cst {dimension_numbers = #tpu.dot_dimension_numbers<[1], [0], [0], [1], [0, 0, 1, 1], [], []>} : vector<16x96xf32>, vector<96x256xf32>, vector<16x256xf32> -> vector<16x256xf32>
    %c0_7 = arith.constant 0 : index
    %c0_8 = arith.constant 0 : index
    %12 = vector.load %arg5[%c0_7, %c0_8] : memref<1x256xf32, #tpu.memory_space<vmem>>, vector<1x256xf32>
    %13 = vector.broadcast %12 : vector<1x256xf32> to vector<16x256xf32>
    %14 = arith.addf %11, %13 : vector<16x256xf32>
    %15 = arith.mulf %14, %14 : vector<16x256xf32>
    %16 = arith.mulf %15, %14 : vector<16x256xf32>
    %cst_9 = arith.constant 4.471500e-02 : f32
    %17 = vector.broadcast %cst_9 : f32 to vector<16x256xf32>
    %18 = arith.mulf %17, %16 : vector<16x256xf32>
    %19 = arith.addf %14, %18 : vector<16x256xf32>
    %cst_10 = arith.constant 0.797884583 : f32
    %20 = vector.broadcast %cst_10 : f32 to vector<16x256xf32>
    %21 = arith.mulf %20, %19 : vector<16x256xf32>
    %cst_11 = arith.constant 5.000000e-01 : f32
    %22 = vector.broadcast %cst_11 : f32 to vector<16x256xf32>
    %23 = arith.mulf %22, %14 : vector<16x256xf32>
    %24 = math.tanh %21 : vector<16x256xf32>
    %cst_12 = arith.constant 1.000000e+00 : f32
    %25 = vector.broadcast %cst_12 : f32 to vector<16x256xf32>
    %26 = arith.addf %25, %24 : vector<16x256xf32>
    %27 = arith.mulf %23, %26 : vector<16x256xf32>
    %28 = vector.extract_strided_slice %27 {offsets = [0, 0], sizes = [16, 128], strides = [1, 1]} : vector<16x256xf32> to vector<16x128xf32>
    %29 = vector.extract_strided_slice %27 {offsets = [0, 128], sizes = [16, 128], strides = [1, 1]} : vector<16x256xf32> to vector<16x128xf32>
    %c1_i32_13 = arith.constant 1 : i32
    %30 = tpu.dynamic_rotate %28 by %c1_i32_13 dim 0 : vector<16x128xf32>, i32 -> vector<16x128xf32>
    %31 = vector.broadcast %1 : vector<16x1xf32> to vector<16x128xf32>
    %32 = arith.mulf %31, %30 : vector<16x128xf32>
    %c0_14 = arith.constant 0 : index
    %c0_15 = arith.constant 0 : index
    %33 = vector.load %arg6[%c0_14, %c0_15] : memref<3x128xf32, #tpu.memory_space<vmem>>, vector<1x128xf32>
    %34 = vector.broadcast %33 : vector<1x128xf32> to vector<16x128xf32>
    %35 = arith.mulf %32, %34 : vector<16x128xf32>
    %c1 = arith.constant 1 : index
    %c0_16 = arith.constant 0 : index
    %36 = vector.load %arg6[%c1, %c0_16] : memref<3x128xf32, #tpu.memory_space<vmem>>, vector<1x128xf32>
    %37 = vector.broadcast %36 : vector<1x128xf32> to vector<16x128xf32>
    %38 = arith.mulf %28, %37 : vector<16x128xf32>
    %39 = arith.addf %35, %38 : vector<16x128xf32>
    %c15_i32_17 = arith.constant 15 : i32
    %40 = tpu.dynamic_rotate %28 by %c15_i32_17 dim 0 : vector<16x128xf32>, i32 -> vector<16x128xf32>
    %41 = vector.broadcast %2 : vector<16x1xf32> to vector<16x128xf32>
    %42 = arith.mulf %41, %40 : vector<16x128xf32>
    %c2 = arith.constant 2 : index
    %c0_18 = arith.constant 0 : index
    %43 = vector.load %arg6[%c2, %c0_18] : memref<3x128xf32, #tpu.memory_space<vmem>>, vector<1x128xf32>
    %44 = vector.broadcast %43 : vector<1x128xf32> to vector<16x128xf32>
    %45 = arith.mulf %42, %44 : vector<16x128xf32>
    %46 = arith.addf %39, %45 : vector<16x128xf32>
    %c0_19 = arith.constant 0 : index
    %c0_20 = arith.constant 0 : index
    %47 = vector.load %arg7[%c0_19, %c0_20] : memref<1x128xf32, #tpu.memory_space<vmem>>, vector<1x128xf32>
    %48 = vector.broadcast %47 : vector<1x128xf32> to vector<16x128xf32>
    %49 = arith.addf %46, %48 : vector<16x128xf32>
    %50 = arith.mulf %49, %49 : vector<16x128xf32>
    %51 = arith.mulf %50, %49 : vector<16x128xf32>
    %cst_21 = arith.constant 4.471500e-02 : f32
    %52 = vector.broadcast %cst_21 : f32 to vector<16x128xf32>
    %53 = arith.mulf %52, %51 : vector<16x128xf32>
    %54 = arith.addf %49, %53 : vector<16x128xf32>
    %cst_22 = arith.constant 0.797884583 : f32
    %55 = vector.broadcast %cst_22 : f32 to vector<16x128xf32>
    %56 = arith.mulf %55, %54 : vector<16x128xf32>
    %cst_23 = arith.constant 5.000000e-01 : f32
    %57 = vector.broadcast %cst_23 : f32 to vector<16x128xf32>
    %58 = arith.mulf %57, %49 : vector<16x128xf32>
    %59 = math.tanh %56 : vector<16x128xf32>
    %cst_24 = arith.constant 1.000000e+00 : f32
    %60 = vector.broadcast %cst_24 : f32 to vector<16x128xf32>
    %61 = arith.addf %60, %59 : vector<16x128xf32>
    %62 = arith.mulf %58, %61 : vector<16x128xf32>
    %63 = arith.mulf %62, %29 : vector<16x128xf32>
    %c0_25 = arith.constant 0 : index
    %c0_26 = arith.constant 0 : index
    %64 = vector.load %arg8[%c0_25, %c0_26] : memref<128x32xf32, #tpu.memory_space<vmem>>, vector<128x32xf32>
    %cst_27 = arith.constant dense<0.000000e+00> : vector<16x32xf32>
    %65 = tpu.matmul %63, %64, %cst_27 {dimension_numbers = #tpu.dot_dimension_numbers<[1], [0], [0], [1], [0, 0, 1, 1], [], []>} : vector<16x128xf32>, vector<128x32xf32>, vector<16x32xf32> -> vector<16x32xf32>
    %c0_28 = arith.constant 0 : index
    %c0_29 = arith.constant 0 : index
    %66 = vector.load %arg9[%c0_28, %c0_29] : memref<1x32xf32, #tpu.memory_space<vmem>>, vector<1x32xf32>
    %67 = vector.broadcast %66 : vector<1x32xf32> to vector<16x32xf32>
    %68 = arith.addf %65, %67 : vector<16x32xf32>
    %69 = arith.addf %68, %0 : vector<16x32xf32>
    %c0_30 = arith.constant 0 : index
    %c0_31 = arith.constant 0 : index
    %70 = vector.load %arg10[%c0_30, %c0_31] : memref<16x32xf32, #tpu.memory_space<vmem>>, vector<16x32xf32>
    tpu.vector_store %arg10[%c0_30, %c0_31], %69 {strides = array<i32>} : memref<16x32xf32, #tpu.memory_space<vmem>>, vector<16x32xf32>,
    return
  }
  func.func @transform_0(%arg0: i32) -> (i32, i32) {
    %c0_i32 = arith.constant 0 : i32
    %c0_i32_0 = arith.constant 0 : i32
    return %arg0, %c0_i32 : i32, i32
  }
  func.func @transform_1(%arg0: i32) -> (i32, i32) {
    %c0_i32 = arith.constant 0 : i32
    %c0_i32_0 = arith.constant 0 : i32
    return %arg0, %c0_i32 : i32, i32
  }
  func.func @transform_2(%arg0: i32) -> (i32, i32) {
    %c0_i32 = arith.constant 0 : i32
    %c0_i32_0 = arith.constant 0 : i32
    return %arg0, %c0_i32 : i32, i32
  }
  func.func @transform_3(%arg0: i32) -> (i32, i32) {
    %c0_i32 = arith.constant 0 : i32
    %c0_i32_0 = arith.constant 0 : i32
    %c0_i32_1 = arith.constant 0 : i32
    return %c0_i32, %c0_i32_0 : i32, i32
  }
  func.func @transform_4(%arg0: i32) -> (i32, i32) {
    %c0_i32 = arith.constant 0 : i32
    %c0_i32_0 = arith.constant 0 : i32
    %c0_i32_1 = arith.constant 0 : i32
    return %c0_i32, %c0_i32_0 : i32, i32
  }
  func.func @transform_5(%arg0: i32) -> (i32, i32) {
    %c0_i32 = arith.constant 0 : i32
    %c0_i32_0 = arith.constant 0 : i32
    %c0_i32_1 = arith.constant 0 : i32
    return %c0_i32, %c0_i32_0 : i32, i32
  }
  func.func @transform_6(%arg0: i32) -> (i32, i32) {
    %c0_i32 = arith.constant 0 : i32
    %c0_i32_0 = arith.constant 0 : i32
    %c0_i32_1 = arith.constant 0 : i32
    return %c0_i32, %c0_i32_0 : i32, i32
  }
  func.func @transform_7(%arg0: i32) -> (i32, i32) {
    %c0_i32 = arith.constant 0 : i32
    %c0_i32_0 = arith.constant 0 : i32
    %c0_i32_1 = arith.constant 0 : i32
    return %c0_i32, %c0_i32_0 : i32, i32
  }
  func.func @transform_8(%arg0: i32) -> (i32, i32) {
    %c0_i32 = arith.constant 0 : i32
    %c0_i32_0 = arith.constant 0 : i32
    %c0_i32_1 = arith.constant 0 : i32
    return %c0_i32, %c0_i32_0 : i32, i32
  }
  func.func @transform_9(%arg0: i32) -> (i32, i32) {
    %c0_i32 = arith.constant 0 : i32
    %c0_i32_0 = arith.constant 0 : i32
    return %arg0, %c0_i32 : i32, i32
  }
}

</mosaic_0001>

<bundles_post_ra>
// kernel: tpu_custom_call.1
= control target key start
LH: loop header
LB: loop body
LE: loop exit
PB: predicated region body
PF: predicated region fallthrough
CT: control target
= control target key end

     0   :  { %14 = vsyncpa [#allocation3], 0  ;;  %s1493_s0 = inlined_call_operand.vmem [shape: f32[32,32], index: 0, kind: input, shape index: {}]   ;;  %s1494_s1 = inlined_call_operand.vmem [shape: f32[32,1], index: 1, kind: input, shape index: {}]   ;;  %s1495_s2 = inlined_call_operand.vmem [shape: f32[32,1], index: 2, kind: input, shape index: {}]   ;;  %s1496_s3 = inlined_call_operand.vmem [shape: f32[96,256], index: 3, kind: input, shape index: {}]   ;;  %s1497_s4 = inlined_call_operand.vmem [shape: f32[1,256], index: 4, kind: input, shape index: {}]   ;;  %s1498_s5 = inlined_call_operand.vmem [shape: f32[3,128], index: 5, kind: input, shape index: {}]   ;;  %s1499_s6 = inlined_call_operand.vmem [shape: f32[1,128], index: 6, kind: input, shape index: {}]   ;;  %s1500_s7 = inlined_call_operand.vmem [shape: f32[128,32], index: 7, kind: input, shape index: {}]   ;;  %s1501_s8 = inlined_call_operand.vmem [shape: f32[1,32], index: 8, kind: input, shape index: {}]   ;;  %s1502_s9 = inlined_call_operand.hbm [shape: f32[32,32], index: 9, kind: output, shape index: {}]  }
   0x1   :  { %16 = vsyncpa [#allocation3 + $0x1], 0  ;;  %s1179_s30 = smov 0   ;;  %s1181_s10 = smov 0  }
   0x2   :  { %s1183_s11 = smov 0   ;;  %s1185_s12 = smov 0  }
   0x3 LB: > { %s1200_s13 = sadd.s32 4294967295, %s1120_s12   ;;  %s866_s14 = sadd.s32 4294967294, %s1120_s12   ;;  %s1120_s12 = sphi %s1185_s12, %s1508_s12   ;;  %s1116_s11 = sphi %s1183_s11, %s1507_s11   ;;  %s1112_s10 = sphi %s1181_s10, %s1506_s10   ;;  %s1108_s30 = sphi %s1179_s30, %s1505_s30  }
   0x4   : > { %s1204_s15 = sadd.s32 1, %s1120_s12   ;;  %s233_s16 = sadd.s32 1, %s1116_s11 }
   0x5   : > { %s230_s17 = ssub.s32 %s1120_s12, %s1204_s15  ;;  %p243_p0 = scmp.ne.s32.totalorder %s1116_s11, %s1112_s10 }
   0x6   : > { %p231_p1 = scmp.eq.s32.totalorder %s230_s17, 0  ;;  %p244_p2 = scmp.eq.s32.totalorder %s1200_s13, 1 }
   0x7   : > { %p249_p3 = scmp.ne.s32.totalorder %s1112_s10, %s1108_s30  ;;  %p250_p4 = scmp.eq.s32.totalorder %s866_s14, 1 }
   0x8   : > { %s1215_s18 = scalar_select %p231_p1, %s1116_s11, %s233_s16  }
   0x9   : > { %p1217_p5 = por %p244_p2, %p243_p0  ;;  %p1221_p6 = por %p250_p4, %p249_p3 }
   0xa   : > { %p869_p7 = scmp.ge.s32.totalorder %s1120_s12, 1  ;;  %p313_p8 = scmp.lt.s32.totalorder %s1120_s12, 3 }
   0xc   : > { %p314_p9 = pnand %p869_p7, %p313_p8 }
   0xd   : > { %s871_s21 = sshll.u32 (!%p314_p9), %s1200_s13, 1  ;;  %v1122_v0 = vmov (!%p314_p9), 0   ;;  %v443_v6 = vld [vmem:[%s1496_s3 + $0x8] sm:$0xff] (!%p314_p9)  ;;  %v445_v7 = vld [vmem:[%s1496_s3 + $0x18] sm:$0xff] (!%p314_p9)  ;;  %v442_v8 = vld [vmem:[%s1496_s3] sm:$0xff] (!%p314_p9)  ;;  %v386_v43 = vlaneseq (!%p314_p9)  ;;  %v1124_v44 = vmov (!%p314_p9), 0.0  }
   0xe   : > { %317 = sbr.rel (%p314_p9) target bundleno = 787 (0x313), region = 56  ;;  %1044 = vset.pattern.permute.xlu0 (!%p314_p9), %v1122_v0  ;;  %p360_p10 = scmp.lt.s32.totalorder (!%p314_p9), %s871_s21, 3  ;;  %1045 = vset.pattern.permute.xlu1 (!%p314_p9), %v1122_v0  ;;  %v943_v9 = vpack.c.bf16 (!%p314_p9), %v445_v7, %v443_v6  ;;  %v444_v10 = vld [vmem:[%s1496_s3 + $0x10] sm:$0xff] (!%p314_p9)  ;;  %v447_v11 = vld [vmem:[%s1496_s3 + $0x28] sm:$0xff] (!%p314_p9)  ;;  %v449_v12 = vld [vmem:[%s1496_s3 + $0x38] sm:$0xff] (!%p314_p9)  ;;  %vm436_vm2 = vcmask (!%p314_p9), 261120  }
   0xf   : > { %v945_v13 = vpack.c.bf16 (!%p314_p9), %v444_v10, %v442_v8  ;;  %v947_v14 = vpack.c.bf16 (!%p314_p9), %v449_v12, %v447_v11  ;;  %v446_v15 = vld [vmem:[%s1496_s3 + $0x20] sm:$0xff] (!%p314_p9)  ;;  %v448_v16 = vld [vmem:[%s1496_s3 + $0x30] sm:$0xff] (!%p314_p9)  ;;  %v451_v17 = vld [vmem:[%s1496_s3 + $0x48] sm:$0xff] (!%p314_p9)  ;;  %549 = vmatprep.mubr.f32.mxu0 (!%p314_p9), %v1124_v44  ;;  %v1315_v45 = vshrl.u32 (!%p314_p9), %v386_v43, 7  ;;  %vm439_vm3 = vcmask (!%p314_p9), 523264   ;;  %s356_s14 = sand.u32 (!%p314_p9), 1, %s1112_s10  }
  0x10   : > { %944 = vmatprep.subr.bf16.mxu0 (!%p314_p9), %v943_v9  ;;  %v453_v19 = vld [vmem:[%s1496_s3 + $0x58] sm:$0xff] (!%p314_p9)  ;;  %v949_v20 = vpack.c.bf16 (!%p314_p9), %v448_v16, %v446_v15  ;;  %v450_v22 = vld [vmem:[%s1496_s3 + $0x40] sm:$0xff] (!%p314_p9)  ;;  %v452_v23 = vld [vmem:[%s1496_s3 + $0x50] sm:$0xff] (!%p314_p9)  ;;  %vm478_vm4 = vcmask (!%p314_p9), 785408   ;;  %s889_s26 = sshll.u32 (!%p314_p9), %s1200_s13, 8  ;;  %s1452_s13 = scalar_lea.sflag (!%p314_p9), [#allocation3], %s356_s14 }
  0x11   : > { %946 = vmatpush1.bf16.msra.mxu0 (!%p314_p9), %v945_v13  ;;  %v951_v21 = vpack.c.bf16 (!%p314_p9), %v453_v19, %v451_v17  ;;  %v455_v24 = vld [vmem:[%s1496_s3 + $0x68] sm:$0xff] (!%p314_p9)  ;;  %v457_v25 = vld [vmem:[%s1496_s3 + $0x78] sm:$0xff] (!%p314_p9)  ;;  %v953_v26 = vpack.c.bf16 (!%p314_p9), %v452_v23, %v450_v22  ;;  %v454_v28 = vld [vmem:[%s1496_s3 + $0x60] sm:$0xff] (!%p314_p9)  ;;  %vm405_vm0 = vcmp.lt.s32.totalorder (!%p314_p9), %v1315_v45, 7  ;;  %vm388_vm1 = vcmp.lt.s32.totalorder (!%p314_p9), %v1315_v45, 1  ;;  %s1126_s29 = smov (!%p314_p9), [#allocation2]  }
  0x12   : > { %948 = vmatprep.subr.bf16.mxu0 (!%p314_p9), %v947_v14  ;;  %v955_v27 = vpack.c.bf16 (!%p314_p9), %v457_v25, %v455_v24  ;;  %v456_v29 = vld [vmem:[%s1496_s3 + $0x70] sm:$0xff] (!%p314_p9)  ;;  %v459_v30 = vld [vmem:[%s1496_s3 + $0x88] sm:$0xff] (!%p314_p9)  ;;  %v461_v31 = vld [vmem:[%s1496_s3 + $0x98] sm:$0xff] (!%p314_p9) }
  0x13   : > { %v957_v32 = vpack.c.bf16 (!%p314_p9), %v456_v29, %v454_v28  ;;  %v959_v33 = vpack.c.bf16 (!%p314_p9), %v461_v31, %v459_v30  ;;  %v458_v34 = vld [vmem:[%s1496_s3 + $0x80] sm:$0xff] (!%p314_p9)  ;;  %v460_v35 = vld [vmem:[%s1496_s3 + $0x90] sm:$0xff] (!%p314_p9)  ;;  %v463_v36 = vld [vmem:[%s1496_s3 + $0xa8] sm:$0xff] (!%p314_p9) }
  0x14   : > { %v465_v37 = vld [vmem:[%s1496_s3 + $0xb8] sm:$0xff] (!%p314_p9)  ;;  %v961_v38 = vpack.c.bf16 (!%p314_p9), %v460_v35, %v458_v34  ;;  %v462_v40 = vld [vmem:[%s1496_s3 + $0xa0] sm:$0xff] (!%p314_p9)  ;;  %v464_v41 = vld [vmem:[%s1496_s3 + $0xb0] sm:$0xff] (!%p314_p9) }
  0x15   : > { %s1510_s21 = smov (!%p360_p10, %s871_s21), 3  ;;  %950 = vmatpush1.bf16.msra.mxu0 %v949_v20  ;;  %v963_v39 = vpack.c.bf16 %v465_v37, %v463_v36  ;;  %v965_v42 = vpack.c.bf16 %v464_v41, %v462_v40  ;;  %v664_v7 = vld [vmem:[%s1500_s7] sm:$0xff]  ;;  %v665_v8 = vld [vmem:[%s1500_s7 + $0x8] sm:$0xff]  ;;  %v666_v10 = vld [vmem:[%s1500_s7 + $0x10] sm:$0xff] }
  0x16   : > { %s872_s22 = sshll.u32 %s1510_s21, 3  ;;  %s1123_s21 = smov 32   ;;  %952 = vmatprep.subr.bf16.mxu0 %v951_v21  ;;  %v967_v9 = vpack.c.bf16 %v665_v8, %v664_v7  ;;  %v667_v11 = vld [vmem:[%s1500_s7 + $0x18] sm:$0xff]  ;;  %v668_v13 = vld [vmem:[%s1500_s7 + $0x20] sm:$0xff]  ;;  %v669_v14 = vld [vmem:[%s1500_s7 + $0x28] sm:$0xff] }
  0x17   : > { %s375_s25 = scalar_lea.vmem %s1495_s2, %s872_s22  ;;  %s369_s28 = scalar_lea.vmem %s1494_s1, %s872_s22  ;;  %v971_v12 = vpack.c.bf16 %v667_v11, %v666_v10  ;;  %v975_v15 = vpack.c.bf16 %v669_v14, %v668_v13  ;;  %v670_v16 = vld [vmem:[%s1500_s7 + $0x30] sm:$0xff]  ;;  %v671_v17 = vld [vmem:[%s1500_s7 + $0x38] sm:$0xff]  ;;  %v672_v20 = vld [vmem:[%s1500_s7 + $0x40] sm:$0xff] }
  0x18   : > { %v382_v1 = vld [vmem:[%s375_s25] sm:$0xff]  ;;  %v383_v3 = vld [vmem:[%s375_s25 + $0x8] sm:$0xff]  ;;  %s363_s16 = scalar_lea.vmem %s1493_s0, %s872_s22  ;;  %968 = vmatprep.subr.bf16.mxu1 %v967_v9  ;;  %v979_v19 = vpack.c.bf16 %v671_v17, %v670_v16  ;;  %v674_v23 = vld [vmem:[%s1500_s7 + $0x50] sm:$0xff] }
  0x19   : > { %v380_v2 = vld [vmem:[%s369_s28] sm:$0xff]  ;;  %410 = vperm.xlu0 %1044, %v382_v1   ;;  %v381_v4 = vld [vmem:[%s369_s28 + $0x8] sm:$0xff]  ;;  %954 = vmatpush1.bf16.msra.mxu0 %v953_v26  ;;  %v675_v24 = vld [vmem:[%s1500_s7 + $0x58] sm:$0xff]  ;;  %s1445_s28 = scalar_lea.hbm %s1502_s9, %s889_s26 }
  0x1a   : > { %393 = vperm.xlu1 %1045, %v380_v2   ;;  %v1237_v5 = vld [vmem:[%s363_s16] sm:$0xff]  ;;  %v1267_v18 = vld [vmem:[%s363_s16 + $0x8] sm:$0xff]  ;;  %956 = vmatprep.subr.bf16.mxu0 %v955_v27  ;;  %s1125_s16 = smov 64   ;;  %v987_v25 = vpack.c.bf16 %v675_v24, %v674_v23  ;;  %v678_v29 = vld [vmem:[%s1500_s7 + $0x70] sm:$0xff] }
  0x1b   : > { %v403_v46 = vrot.slane %v1237_v5, 1  ;;  %v404_v47 = vrot.slane %v1267_v18, 1  ;;  %v384_v54 = vrot.slane %v1237_v5, 7  ;;  %v385_v55 = vrot.slane %v1267_v18, 7  ;;  %970 = vmatpush3.bf16.msra.mxu1 %v967_v9  ;;  %v673_v21 = vld [vmem:[%s1500_s7 + $0x48] sm:$0xff]  ;;  %v676_v26 = vld [vmem:[%s1500_s7 + $0x60] sm:$0xff] }
  0x1c   : > { %972 = vmatprep.subr.bf16.mxu1 %v971_v12  ;;  %v983_v22 = vpack.c.bf16 %v673_v21, %v672_v20  ;;  %v677_v27 = vld [vmem:[%s1500_s7 + $0x68] sm:$0xff]  ;;  %v679_v30 = vld [vmem:[%s1500_s7 + $0x78] sm:$0xff]  ;;  %v881_v24 = vld [vmem:[%s1498_s5 + $0x2] ss:$0 sm:$0xff] }
  0x1d   : > { %415 = vperm.xlu0 %1044, %v383_v3   ;;  %958 = vmatpush1.bf16.msra.mxu0 %v957_v32  ;;  %v406_v48 = vsel %vm405_vm0, %v403_v46, %v404_v47  ;;  %v407_v51 = vsel %vm405_vm0, %v404_v47, %v403_v46  ;;  %v390_v57 = vsel %vm388_vm1, %v385_v55, %v384_v54  ;;  %v470_v32 = vsub.s32 0, %v1315_v45 }
  0x1e   : > { %398 = vperm.xlu1 %1045, %v381_v4   ;;  %960 = vmatprep.subr.bf16.mxu0 %v959_v33  ;;  %v389_v61 = vsel %vm388_vm1, %v384_v54, %v385_v55  ;;  %v991_v28 = vpack.c.bf16 %v677_v27, %v676_v26  ;;  %v995_v31 = vpack.c.bf16 %v679_v30, %v678_v29  ;;  %v466_v33 = vld [vmem:[%s1497_s4] sm:$0x3]  ;;  %v474_v54 = vsub.s32 1, %v1315_v45 }
  0x1f   : > { %974 = vmatpush3.bf16.msra.mxu1 %v971_v12  ;;  %v471_v34 = vrot.slane %v466_v33, %v470_v32  ;;  %v880_v12 = vld [vmem:[%s1498_s5 + $0x1] ss:$0 sm:$0xff] }
  0x20   : > { %976 = vmatprep.subr.bf16.mxu1 %v975_v15  ;;  %v475_v55 = vrot.slane %v466_v33, %v474_v54 }
  0x21   : > { %422 = vrot.lane.b32.xlu0 %v1237_v5, %s1123_s21  ;;  %962 = vmatpush1.bf16.msra.mxu0 %v961_v38 }
  0x22   : > { %964 = vmatprep.subr.bf16.mxu0 %v963_v39 }
  0x23   : > { %978 = vmatpush3.bf16.msra.mxu1 %v975_v15  ;;  %v879_v15 = vld [vmem:[%s1498_s5] ss:$0 sm:$0xff] }
  0x24   : > { %980 = vmatprep.subr.bf16.mxu1 %v979_v19 }
  0x25   : > { %424 = vrot.lane.b32.xlu0 %v1267_v18, %s1123_s21  ;;  %966 = vmatpush1.bf16.msra.mxu0 %v965_v42  ;;  %s870_s21 = sshll.u32 %s356_s14, 4 }
  0x26   : > { %s358_s24 = scalar_lea.vmem [#allocation2], %s870_s21  ;;  %s1062_s21 = sshll.u32 %s1126_s29, 4  ;;  %s1063_s21 = int_to_ptr.vmem [resolvable:$false] %s1062_s21 }
  0x27   : > { %982 = vmatpush3.bf16.msra.mxu1 %v979_v19  ;;  %s1064_s17 = scalar_lea.vmem %s1063_s21, 512 }
  0x28   : > { %984 = vmatprep.subr.bf16.mxu1 %v983_v22 }
  0x2b   : > { %986 = vmatpush3.bf16.msra.mxu1 %v983_v22 }
  0x2c   : > { %988 = vmatprep.subr.bf16.mxu1 %v987_v25 }
  0x2f   : > { %990 = vmatpush3.bf16.msra.mxu1 %v987_v25 }
  0x30   : > { %992 = vmatprep.subr.bf16.mxu1 %v991_v28 }
  0x33   : > { %994 = vmatpush3.bf16.msra.mxu1 %v991_v28 }
  0x34   : > { %996 = vmatprep.subr.bf16.mxu1 %v995_v31 }
  0x37   : > { %998 = vmatpush3.bf16.msra.mxu1 %v995_v31 }
  0x98   : > { %v1322_v49 = vpop.permute.xlu0 %410 }
  0x99   : > { %v418_v50 = vmul.f32 %v1322_v49, %v406_v48  ;;  %v1333_v56 = vpop.permute.xlu1 %393 }
  0x9a   : > { %v401_v59 = vmul.f32 %v1333_v56, %v390_v57 }
  0x9b   : > { %430 = vrot.lane.b32.xlu1 %v418_v50, %s1125_s16 }
  0x9c   : > { %v1327_v52 = vpop.permute.xlu0 %415 }
  0x9d   : > { %v419_v53 = vmul.f32 %v1327_v52, %v407_v51  ;;  %v1338_v60 = vpop.permute.xlu1 %398 }
  0x9e   : > { %v402_v63 = vmul.f32 %v1338_v60, %v389_v61 }
  0x9f   : > { %432 = vrot.lane.b32.xlu1 %v419_v53, %s1125_s16  ;;  %s780_s16 = sshll.u32 %s358_s24, 4  ;;  %s1447_s16 = int_to_ptr.vmem [resolvable:$true] %s780_s16 }
  0xa0   : > { %v423_v58 = vpop.permute.xlu0 %422  ;;  %s1058_s22 = scalar_lea.vmem %s1447_s16, 256  ;;  %p1065_p0 = scmp.lt.s32.totalorder %s1447_s16, %s1063_s21 }
  0xa1   : > { %v437_v62 = vsel %vm436_vm2, %v401_v59, %v423_v58  ;;  %p1059_p11 = scmp.ne.s32.totalorder %s1447_s16, %s1058_s22  ;;  %p1066_p1 = scmp.lt.s32.totalorder %s1064_s17, %s1058_s22 }
  0xa3   : > { %p1060_p12 = pnand %p1059_p11, %p1217_p5  ;;  %p1067_p2 = por %p1066_p1, %p1065_p0 }
  0xa4   : > { %v425_v1 = vpop.permute.xlu0 %424 }
  0xa5   : > { %v438_v3 = vsel %vm436_vm2, %v402_v63, %v425_v1  ;;  %p1061_p13 = pneg %p1060_p12 }
  0xa7   : > { %p1068_p3 = pnand %p1067_p2, %p1061_p13 }
 0x10d   : > { %v431_v0 = vpop.permute.xlu1 %430 }
 0x10e   : > { %v440_v2 = vsel %vm439_vm3, %v437_v62, %v431_v0 }
 0x10f   : > { %877 = vmatmul.mubr.msk.f32.vlgmr.msra.gmra.mrb[0].mxu0 %vm478_vm4, %v440_v2 }
 0x110   : > { %555 = vmatprep.mubr.f32.mxu0 %v1124_v44 }
 0x111   : > { %v433_v4 = vpop.permute.xlu1 %432 }
 0x112   : > { %v441_v6 = vsel %vm439_vm3, %v438_v3, %v433_v4 }
 0x113   : > { %878 = vmatmul.mubr.msk.f32.gmra.mrb[2].mxu0 %vm478_vm4, %v441_v6 }
 0x1e2   : > { %v551_v35 = vpop.f32.mrb[0].mxu0 }
 0x1e3   : > { %v552_v36 = vadd.f32 %v551_v35, %v471_v34  ;;  %v553_v37 = vpop.f32.mrb[1].mxu0 }
 0x1e4   : > { %v1398_v59 = vadd.f32 %v553_v37, %v475_v55 }
 0x1e5   : > { %v562_v38 = vmul.f32 %v552_v36, %v552_v36  ;;  %v582_v61 = vmul.f32 0.5, %v552_v36 }
 0x1e6   : > { %v557_v39 = vpop.f32.mrb[2].mxu0  ;;  %v563_v3 = vmul.f32 %v1398_v59, %v1398_v59 }
 0x1e7   : > { %v566_v40 = vmul.f32 %v562_v38, %v552_v36  ;;  %v558_v41 = vadd.f32 %v557_v39, %v471_v34  ;;  %v559_v42 = vpop.f32.mrb[3].mxu0 }
 0x1e8   : > { %v1400_v63 = vadd.f32 %v559_v42, %v475_v55  ;;  %v567_v11 = vmul.f32 %v563_v3, %v1398_v59 }
 0x1e9   : > { %v570_v43 = vmul.f32 0.044715, %v566_v40  ;;  %v564_v44 = vmul.f32 %v558_v41, %v558_v41  ;;  %v584_v1 = vmul.f32 0.5, %v558_v41 }
 0x1ea   : > { %v565_v6 = vmul.f32 %v1400_v63, %v1400_v63  ;;  %v571_v45 = vmul.f32 0.044715, %v567_v11 }
 0x1eb   : > { %v574_v46 = vadd.f32 %v570_v43, %v552_v36  ;;  %v568_v47 = vmul.f32 %v564_v44, %v558_v41 }
 0x1ec   : > { %v569_v23 = vmul.f32 %v565_v6, %v1400_v63  ;;  %v575_v33 = vadd.f32 %v571_v45, %v1398_v59 }
 0x1ed   : > { %v578_v48 = vmul.f32 0.7978846, %v574_v46  ;;  %v572_v50 = vmul.f32 0.044715, %v568_v47 }
 0x1ee   : > { %v579_v39 = vmul.f32 0.7978846, %v575_v33 }
 0x1ef   : > { %1046 = vtanh.f32 %v578_v48  ;;  %v576_v51 = vadd.f32 %v572_v50, %v558_v41 }
 0x1f1   : > { %v580_v53 = vmul.f32 0.7978846, %v576_v51 }
 0x1f3   : > { %1048 = vtanh.f32 %v580_v53 }
 0x1f4   : > { %1050 = vtanh.f32 %v579_v39 }
 0x1f9   : > { %v1047_v57 = vpop.eup %1046 }
 0x1fa   : > { %v590_v58 = vadd.f32 1.0, %v1047_v57 }
 0x1fc   : > { %v594_v0 = vmul.f32 %v590_v58, %v582_v61  ;;  %v583_v61 = vmul.f32 0.5, %v1398_v59  ;;  %v883_v59 = vld [vmem:[%s1501_s8] ss:$0 sm:$0xff] }
 0x1fd   : > { %v1049_v62 = vpop.eup %1048 }
 0x1fe   : > { %v592_v2 = vadd.f32 1.0, %v1049_v62  ;;  %v598_v7 = vrot.slane %v594_v0, 7  ;;  %v620_v8 = vrot.slane %v594_v0, 1  ;;  %v616_v25 = vmul.f32 %v880_v12, %v594_v0  ;;  %v1051_v51 = vpop.eup %1050 }
 0x1ff   : > { %v591_v54 = vadd.f32 1.0, %v1051_v51 }
 0x200   : > { %v596_v4 = vmul.f32 %v592_v2, %v584_v1  ;;  %v585_v1 = vmul.f32 0.5, %v1400_v63 }
 0x202   : > { %v599_v9 = vrot.slane %v596_v4, 7  ;;  %v621_v10 = vrot.slane %v596_v4, 1  ;;  %v617_v27 = vmul.f32 %v880_v12, %v596_v4  ;;  %v595_v4 = vmul.f32 %v591_v54, %v583_v61 }
 0x204   : > { %v600_v13 = vsel %vm388_vm1, %v598_v7, %v599_v9  ;;  %v601_v14 = vsel %vm388_vm1, %v599_v9, %v598_v7  ;;  %v623_v16 = vsel %vm405_vm0, %v621_v10, %v620_v8  ;;  %v622_v17 = vsel %vm405_vm0, %v620_v8, %v621_v10 }
 0x205   : > { %v603_v19 = vmul.f32 %v600_v13, %v1338_v60  ;;  %v602_v20 = vmul.f32 %v601_v14, %v1333_v56  ;;  %v624_v21 = vmul.f32 %v622_v17, %v1322_v49  ;;  %v625_v22 = vmul.f32 %v623_v16, %v1327_v52  ;;  %v882_v49 = vld [vmem:[%s1499_s6] ss:$0 sm:$0xff] }
 0x206   : > { %v573_v56 = vmul.f32 0.044715, %v569_v23 }
 0x207   : > { %v610_v26 = vmul.f32 %v879_v15, %v603_v19  ;;  %v609_v28 = vmul.f32 %v879_v15, %v602_v20  ;;  %v631_v60 = vmul.f32 %v881_v24, %v624_v21  ;;  %v632_v31 = vmul.f32 %v881_v24, %v625_v22 }
 0x208   : > { %v577_v36 = vadd.f32 %v573_v56, %v1400_v63 }
 0x209   : > { %v619_v29 = vadd.f32 %v617_v27, %v610_v26  ;;  %v618_v30 = vadd.f32 %v616_v25, %v609_v28 }
 0x20a   : > { %v581_v42 = vmul.f32 0.7978846, %v577_v36 }
 0x20b   : > { %v633_v52 = vadd.f32 %v631_v60, %v618_v30  ;;  %v634_v32 = vadd.f32 %v632_v31, %v619_v29 }
 0x20c   : > { %1052 = vtanh.f32 %v581_v42 }
 0x20d   : > { %v642_v34 = vadd.f32 %v882_v49, %v633_v52  ;;  %v643_v35 = vadd.f32 %v882_v49, %v634_v32 }
 0x20f   : > { %v644_v37 = vmul.f32 %v642_v34, %v642_v34  ;;  %v645_v38 = vmul.f32 %v643_v35, %v643_v35  ;;  %v654_v62 = vmul.f32 0.5, %v642_v34  ;;  %v655_v2 = vmul.f32 0.5, %v643_v35 }
 0x211   : > { %v646_v40 = vmul.f32 %v644_v37, %v642_v34  ;;  %v647_v41 = vmul.f32 %v645_v38, %v643_v35 }
 0x213   : > { %v648_v43 = vmul.f32 0.044715, %v646_v40  ;;  %v649_v44 = vmul.f32 0.044715, %v647_v41 }
 0x215   : > { %v650_v46 = vadd.f32 %v648_v43, %v642_v34  ;;  %v651_v47 = vadd.f32 %v649_v44, %v643_v35 }
 0x216   : > { %v1053_v53 = vpop.eup %1052 }
 0x217   : > { %v652_v48 = vmul.f32 0.7978846, %v650_v46  ;;  %v653_v50 = vmul.f32 0.7978846, %v651_v47  ;;  %v593_v57 = vadd.f32 1.0, %v1053_v53 }
 0x219   : > { %1054 = vtanh.f32 %v652_v48  ;;  %v597_v7 = vmul.f32 %v593_v57, %v585_v1 }
 0x21a   : > { %1056 = vtanh.f32 %v653_v50 }
 0x223   : > { %v1055_v55 = vpop.eup %1054 }
 0x224   : > { %v1057_v58 = vpop.eup %1056  ;;  %v658_v0 = vadd.f32 1.0, %v1055_v55 }
 0x225   : > { %v659_v3 = vadd.f32 1.0, %v1057_v58 }
 0x226   : > { %v660_v6 = vmul.f32 %v658_v0, %v654_v62 }
 0x227   : > { %v661_v8 = vmul.f32 %v659_v3, %v655_v2 }
 0x228   : > { %v662_v9 = vmul.f32 %v660_v6, %v595_v4 }
 0x229   : > { %v663_v10 = vmul.f32 %v661_v8, %v597_v7 }
 0x22a   : > { %940 = vmatprep.mubr.f32.mxu1 %v662_v9 }
 0x22b   : > { %941 = vmatmul.mubr.f32.vlgmr.msra.gmra.mrb[0].mxu1 %v663_v10 }
 0x2fe   : > { %v942_v11 = vpop.f32.mrb[0].mxu1 }
 0x2ff   : > { %v759_v63 = vadd.f32 %v942_v11, %v883_v59  ;;  %v753_v12 = vpop.f32.mrb[1].mxu1 }
 0x300   : > { %v754_v13 = vadd.f32 %v883_v59, %v753_v12 }
 0x301   : > { %v763_v14 = vadd.f32 %v759_v63, %v1267_v18 }
 0x302   : > { %v762_v15 = vadd.f32 %v754_v13, %v1237_v5 }
 0x303   : > { %765 = vst.msk [vmem:[%s358_s24 + $0x8] sm:$0xff] %vm436_vm2, %v763_v14 }
 0x304   : > { %764 = vst.msk [vmem:[%s358_s24] sm:$0xff] %vm436_vm2, %v762_v15 }
 0x305   : > { %1071 = shalt.err (!%p1068_p3)
}
 0x306   : > { %s1072_s14 = scalar_lea.hbm %s1445_s28, 256  ;;  %s1076_s26 = scalar_lea.hbm %s1502_s9, 512 }
 0x307   : > { %p1073_p4 = scmp.ne.s32.totalorder %s1445_s28, %s1072_s14  ;;  %p1077_p9 = scmp.lt.u32.totalorder %s1445_s28, %s1502_s9 }
 0x308   : > { %p1078_p10 = scmp.lt.u32.totalorder %s1076_s26, %s1072_s14  ;;  %p1080_p12 = scmp.lt.u32.totalorder %s1072_s14, %s1445_s28 }
 0x309   : > { %p1074_p7 = pnand %p1073_p4, %p1217_p5 }
 0x30a   : > { %p1079_p11 = por %p1078_p10, %p1077_p9 }
 0x30b   : > { %p1075_p8 = pneg %p1074_p7 }
 0x30c   : > { %p1081_p13 = por %p1080_p12, %p1079_p11 }
 0x30e   : > { %p1082_p0 = pnand %p1081_p13, %p1075_p8 }
 0x310   : > { %1085 = shalt.err (!%p1082_p0)
}
 0x311   : > { %s1127_s22 = smov 128   ;;  %s1128_s29 = smov 8  }
 0x312   : > { %999 = dma.vmem_to_hbm [thread:$0]  (%p1217_p5), %s1447_s16, 256, %s1445_s28, %s1452_s13, %s1127_s22, %s1127_s22, %s1128_s29  }
 0x313 PF: > { %p1005_p1 = scmp.ge.s32.totalorder %s1120_s12, 2  ;;  %s795_s21 = sand.u32 1, %s1108_s30  }
 0x314   : > { %s796_s17 = scalar_lea.sflag [#allocation3], %s795_s21 }
 0x315   : > { %p1002_p2 = pnand %p1005_p1, %p1221_p6 }
 0x317   : > { %1103 = dma.done.wait (!%p1002_p2), %s796_s17, 256  }
 0x318   : > { %1105 = vsyncadd (!%p1002_p2), %s796_s17, 4294967040  ;;  %p19_p3 = scmp.ge.s32.totalorder %s1204_s15, 4   ;;  %s1505_s30 = smov %s1112_s10 }
 0x319   : > { %s1506_s10 = smov %s1116_s11  ;;  %s1507_s11 = smov %s1215_s18 }
 0x31a   : > { %s1508_s12 = smov %s1204_s15  ;;  %21 = sbr.rel (!%p19_p3) target bundleno = 3 (0x3), region = 97 }
 0x321   :  { %801 = vsyncpa [#allocation3], 1 }
 0x322   :  { %803 = vsyncpa [#allocation3 + $0x1], 1 }

</bundles_post_ra>
